<compile_context>
chip_gen: v7x
topology: tpu7x:2x2x1
jax: 0.10.0
libtpu: 0.0.40
codegen_flags: <defaults>
</compile_context>

<pallas_src>
import functools

import jax
import jax.numpy as jnp
from jax.experimental import pallas as pl
from jax.experimental.pallas import tpu as pltpu

LANE = 128
_TB_MAX = 512                 # ~85% of HBM roofline per measured tile table
_VMEM_TARGET = 40 << 20       # working-set target (fits v7x's 64 MiB VMEM)
_VMEM_CAP = 56 << 20          # never request more scoped VMEM than this


def _round_up(n, m):
    return (n + m - 1) // m * m


def _cdiv(a, b):
    return (a + b - 1) // b


def prepare_params(w_project, b_project, w_gate, b_gate,
                   matmul_dtype=jnp.bfloat16):
    """One-time parameter prep (hoisted out of the per-call path).

    Builds fused  W: (2*Dp, 4*Dp)  and  b: (1, 4*Dp)  whose column slots
    (each Dp = round_up(D, 128) wide, lane-tile aligned) are [ z | g0 | g1 | g2 ].
    Rows are laid out to match a lane-padded input [ x0 | pad | x1 | pad ] so
    no identity passthrough slots are needed.
    PyTorch Linear layouts: w_project (D, 2D), w_gate (3D, 2D)  (out, in).
    """
    D = w_project.shape[0]
    assert w_project.shape == (D, 2 * D)
    assert b_project.shape == (D,)
    assert w_gate.shape == (3 * D, 2 * D)
    assert b_gate.shape == (3 * D,)
    Dp = _round_up(D, LANE)
    K = 2 * Dp

    wpT = jnp.transpose(w_project).astype(jnp.float32)   # (2D, D)   y = flat @ W^T
    wgT = jnp.transpose(w_gate).astype(jnp.float32)      # (2D, 3D)

    def pad_cols(w):                                      # (2D, D) -> (2D, Dp)
        return jnp.pad(w, ((0, 0), (0, Dp - D)))

    w_cat = jnp.concatenate(
        [pad_cols(wpT),
         pad_cols(wgT[:, 0 * D:1 * D]),
         pad_cols(wgT[:, 1 * D:2 * D]),
         pad_cols(wgT[:, 2 * D:3 * D])], axis=1)          # (2D, 4*Dp)

    # Row-pad each input half to Dp rows to match the lane-padded x layout.
    w_fused = jnp.zeros((K, 4 * Dp), jnp.float32)
    w_fused = w_fused.at[0:D].set(w_cat[0:D])
    w_fused = w_fused.at[Dp:Dp + D].set(w_cat[D:2 * D])
    # bf16 operands halve weight HBM/VMEM bytes and double MXU rate;
    # accumulation stays f32 in the kernel (preferred_element_type).
    w_fused = w_fused.astype(matmul_dtype)

    def pad_bias(b):                                      # (D,) -> (Dp,)
        return jnp.pad(b.astype(jnp.float32), (0, Dp - D))

    b_fused = jnp.concatenate(
        [pad_bias(b_project),
         pad_bias(b_gate[0 * D:1 * D]),
         pad_bias(b_gate[1 * D:2 * D]),
         pad_bias(b_gate[2 * D:3 * D])]).reshape(1, 4 * Dp)
    return w_fused, b_fused, D, Dp


def _recursive_cell_kernel(xf_ref, w_ref, b_ref, o_ref, *, D, Dp):
    xf = xf_ref[...]                                      # (tb, 2*Dp), input dtype

    # Single fused MXU launch (project + 3 gate slots), f32 accumulation.
    y = jnp.dot(xf.astype(w_ref.dtype), w_ref[...],
                preferred_element_type=jnp.float32) + b_ref[...]

    z = y[:, 0 * Dp:1 * Dp]
    g0 = y[:, 1 * Dp:2 * Dp]
    g1 = y[:, 2 * Dp:3 * Dp]
    g2 = y[:, 3 * Dp:4 * Dp]

    # Exact (uncast) passthrough of the inputs; lane-tile-aligned slices.
    x0 = xf[:, 0 * Dp:1 * Dp].astype(jnp.float32)
    x1 = xf[:, 1 * Dp:2 * Dp].astype(jnp.float32)

    # Softmax over the 3 gate slots.  exp on the EUP; all elementwise math in
    # f32 (v5e has no bf16 VPU/EUP).  Max-subtraction kept for numerical
    # safety; on v7x (EUP-bound) it could be dropped if gates are bounded.
    m = jnp.maximum(jnp.maximum(g0, g1), g2)
    e0 = jnp.exp(g0 - m)
    e1 = jnp.exp(g1 - m)
    e2 = jnp.exp(g2 - m)
    s = e0 + e1 + e2
    inv = pl.reciprocal(s, approx=True)                   # EUP seed ...
    inv = inv * (2.0 - s * inv)                           # ... + Newton step (VPU)

    res = (x0 * e0 + x1 * e1 + z * e2) * inv
    if D != Dp:
        res = res[:, :D]                                  # store only real lanes
    o_ref[...] = res.astype(o_ref.dtype)


def _pick_batch_tile(B):
    if B < 16:
        return B                      # single block (block dim == full array dim)
    # >= 2 grid steps whenever possible so v7x's two TensorCores both get work.
    return min(_TB_MAX, _round_up(_cdiv(B, 2), 8))


def _vmem_footprint(tb, K, N, Dp, x_itemsize, w_itemsize):
    xf_t = 2 * tb * K * x_itemsize            # double-buffered input tile
    out_t = 2 * tb * Dp * 4                   # double-buffered output tile
    w_t = 2 * (K * N * w_itemsize + N * 4)    # resident weights + bias (dbl-buffered)
    y_t = tb * N * 4                          # f32 matmul result
    ew_t = 8 * tb * Dp * 4                    # elementwise temporaries
    return xf_t + out_t + w_t + y_t + ew_t


def recursive_cell(x, w_fused, b_fused, D, Dp, out_dtype=None):
    """x: (B, 2, D). w_fused/b_fused/D/Dp from prepare_params (done once)."""
    B, two, D_in = x.shape
    assert two == 2 and D_in == D
    K, N = 2 * Dp, 4 * Dp
    assert w_fused.shape == (K, N) and b_fused.shape == (1, N)
    out_dtype = x.dtype if out_dtype is None else out_dtype

    if Dp != D:
        # One lane-aligned pad of x (fuses with the producer under jit);
        # replaces the former MXU identity-slot passthrough.
        xf = jnp.pad(x, ((0, 0), (0, 0), (0, Dp - D))).reshape(B, K)
    else:
        xf = x.reshape(B, K)                  # contiguous flatten — free, no copy

    x_itemsize = jnp.dtype(x.dtype).itemsize
    w_itemsize = jnp.dtype(w_fused.dtype).itemsize

    tb = _pick_batch_tile(B)
    while (tb % 8 == 0 and tb > 8 and
           _vmem_footprint(tb, K, N, Dp, x_itemsize, w_itemsize) > _VMEM_TARGET):
        tb = max(8, _round_up(tb // 2, 8))
    footprint = _vmem_footprint(tb, K, N, Dp, x_itemsize, w_itemsize)
    vmem_limit = int(min(_VMEM_CAP, max(32 << 20, 2 * footprint)))

    kernel = functools.partial(_recursive_cell_kernel, D=D, Dp=Dp)

    return pl.pallas_call(
        kernel,
        out_shape=jax.ShapeDtypeStruct((B, D), out_dtype),
        grid_spec=pltpu.PrefetchScalarGridSpec(
            num_scalar_prefetch=0,
            grid=(pl.cdiv(B, tb),),           # partial last block is masked
            in_specs=[
                pl.BlockSpec((tb, K), lambda i: (i, 0)),   # lane-padded x tile
                pl.BlockSpec((K, N), lambda i: (0, 0)),    # fused weights (resident)
                pl.BlockSpec((1, N), lambda i: (0, 0)),    # fused bias (resident)
            ],
            out_specs=pl.BlockSpec((tb, D), lambda i: (i, 0)),
        ),
        compiler_params=pltpu.CompilerParams(
            dimension_semantics=("parallel",),
            vmem_limit_bytes=vmem_limit),
    )(xf, w_fused, b_fused)


def recursive_cell_ref(x, w_project, b_project, w_gate, b_gate):
    """Pure-JAX reference mirroring the PyTorch forward."""
    B = x.shape[0]
    flat = x.reshape(B, -1)
    z = (flat @ w_project.T + b_project).reshape(B, 1, -1)
    stacked = jnp.concatenate([x, z], axis=1)             # (B, 3, D)
    g = (flat @ w_gate.T + b_gate).reshape(B, 3, -1)
    g = jax.nn.softmax(g, axis=1)
    return (stacked * g).sum(axis=1)


if __name__ == "__main__":
    B, D = 8, 32
    key = jax.random.PRNGKey(0)
    kx, kwp, kbp, kwg, kbg = jax.random.split(key, 5)

    x = jax.random.normal(kx, (B, 2, D), dtype=jnp.float32)
    # PyTorch Linear shapes: (out, in) / (out,)
    w_project = jax.random.normal(kwp, (D, 2 * D), dtype=jnp.float32) * 0.1
    b_project = jax.random.normal(kbp, (D,), dtype=jnp.float32) * 0.1
    w_gate = jax.random.normal(kwg, (3 * D, 2 * D), dtype=jnp.float32) * 0.1
    b_gate = jax.random.normal(kbg, (3 * D,), dtype=jnp.float32) * 0.1

    # One-time parameter preparation (hoisted out of the per-call path).
    w_fused, b_fused, D_, Dp = prepare_params(w_project, b_project, w_gate, b_gate)
    w_fused, b_fused = jax.block_until_ready((w_fused, b_fused))

    cell = jax.jit(lambda xx, ww, bb: recursive_cell(xx, ww, bb, D_, Dp))
    out = jax.block_until_ready(cell(x, w_fused, b_fused))

    ref = recursive_cell_ref(x, w_project, b_project, w_gate, b_gate)
    assert out.shape == (B, D)
    # bf16 matmul operands (f32 accumulation) give ~1e-3-scale deviation; the
    # Newton-corrected reciprocal itself is essentially exact.
    assert jnp.allclose(out, ref, atol=2e-2, rtol=2e-2), "mismatch vs reference"

    print("KERNEL_OK")
</pallas_src>

<mosaic_0001>
module attributes {stable_mosaic.version = 11 : i64} {
  func.func @_recursive_cell_kernel(%arg0: i32, %arg1: memref<8x256xf32, #tpu.memory_space<vmem>>, %arg2: memref<256x512xbf16, #tpu.memory_space<vmem>>, %arg3: memref<1x512xf32, #tpu.memory_space<vmem>>, %arg4: memref<8x32xf32, #tpu.memory_space<vmem>>) attributes {dimension_semantics = [#tpu.dimension_semantics<parallel>], iteration_bounds = array<i64: 1>, scalar_prefetch = 0 : i64, scratch_operands = 0 : i64, tpu.core_type = #tpu.core_type<tc>, window_params = [{transform_indices = @transform_0, window_bounds = array<i64: 8, 256>}, {pipeline_mode = #tpu.pipeline_mode<synchronous>, transform_indices = @transform_1, window_bounds = array<i64: 256, 512>}, {pipeline_mode = #tpu.pipeline_mode<synchronous>, transform_indices = @transform_2, window_bounds = array<i64: 1, 512>}, {transform_indices = @transform_3, window_bounds = array<i64: 8, 32>}]} {
    %c0 = arith.constant 0 : index
    %c0_0 = arith.constant 0 : index
    %0 = vector.load %arg1[%c0, %c0_0] : memref<8x256xf32, #tpu.memory_space<vmem>>, vector<8x256xf32>
    %1 = arith.truncf %0 : vector<8x256xf32> to vector<8x256xbf16>
    %c0_1 = arith.constant 0 : index
    %c0_2 = arith.constant 0 : index
    %2 = vector.load %arg2[%c0_1, %c0_2] : memref<256x512xbf16, #tpu.memory_space<vmem>>, vector<256x512xbf16>
    %cst = arith.constant dense<0.000000e+00> : vector<8x512xf32>
    %3 = tpu.matmul %1, %2, %cst {dimension_numbers = #tpu.dot_dimension_numbers<[1], [0], [0], [1], [0, 0, 1, 1], [], []>} : vector<8x256xbf16>, vector<256x512xbf16>, vector<8x512xf32> -> vector<8x512xf32>
    %c0_3 = arith.constant 0 : index
    %c0_4 = arith.constant 0 : index
    %4 = vector.load %arg3[%c0_3, %c0_4] : memref<1x512xf32, #tpu.memory_space<vmem>>, vector<1x512xf32>
    %5 = vector.broadcast %4 : vector<1x512xf32> to vector<8x512xf32>
    %6 = arith.addf %3, %5 : vector<8x512xf32>
    %7 = vector.extract_strided_slice %6 {offsets = [0, 0], sizes = [8, 128], strides = [1, 1]} : vector<8x512xf32> to vector<8x128xf32>
    %8 = vector.extract_strided_slice %6 {offsets = [0, 128], sizes = [8, 128], strides = [1, 1]} : vector<8x512xf32> to vector<8x128xf32>
    %9 = vector.extract_strided_slice %6 {offsets = [0, 256], sizes = [8, 128], strides = [1, 1]} : vector<8x512xf32> to vector<8x128xf32>
    %10 = vector.extract_strided_slice %6 {offsets = [0, 384], sizes = [8, 128], strides = [1, 1]} : vector<8x512xf32> to vector<8x128xf32>
    %11 = vector.extract_strided_slice %0 {offsets = [0, 0], sizes = [8, 128], strides = [1, 1]} : vector<8x256xf32> to vector<8x128xf32>
    %12 = vector.extract_strided_slice %0 {offsets = [0, 128], sizes = [8, 128], strides = [1, 1]} : vector<8x256xf32> to vector<8x128xf32>
    %13 = arith.maximumf %8, %9 : vector<8x128xf32>
    %14 = arith.maximumf %13, %10 : vector<8x128xf32>
    %15 = arith.subf %8, %14 : vector<8x128xf32>
    %16 = math.exp %15 : vector<8x128xf32>
    %17 = arith.subf %9, %14 : vector<8x128xf32>
    %18 = math.exp %17 : vector<8x128xf32>
    %19 = arith.subf %10, %14 : vector<8x128xf32>
    %20 = math.exp %19 : vector<8x128xf32>
    %21 = arith.addf %16, %18 : vector<8x128xf32>
    %22 = arith.addf %21, %20 : vector<8x128xf32>
    %23 = tpu.reciprocal %22 {approx = true} : vector<8x128xf32> -> vector<8x128xf32>
    %24 = arith.mulf %22, %23 : vector<8x128xf32>
    %cst_5 = arith.constant 2.000000e+00 : f32
    %25 = vector.broadcast %cst_5 : f32 to vector<8x128xf32>
    %26 = arith.subf %25, %24 : vector<8x128xf32>
    %27 = arith.mulf %23, %26 : vector<8x128xf32>
    %28 = arith.mulf %11, %16 : vector<8x128xf32>
    %29 = arith.mulf %12, %18 : vector<8x128xf32>
    %30 = arith.addf %28, %29 : vector<8x128xf32>
    %31 = arith.mulf %7, %20 : vector<8x128xf32>
    %32 = arith.addf %30, %31 : vector<8x128xf32>
    %33 = arith.mulf %32, %27 : vector<8x128xf32>
    %34 = vector.extract_strided_slice %33 {offsets = [0, 0], sizes = [8, 32], strides = [1, 1]} : vector<8x128xf32> to vector<8x32xf32>
    %c0_6 = arith.constant 0 : index
    %c0_7 = arith.constant 0 : index
    %35 = vector.load %arg4[%c0_6, %c0_7] : memref<8x32xf32, #tpu.memory_space<vmem>>, vector<8x32xf32>
    tpu.vector_store %arg4[%c0_6, %c0_7], %34 {strides = array<i32>} : memref<8x32xf32, #tpu.memory_space<vmem>>, vector<8x32xf32>,
    return
  }
  func.func @transform_0(%arg0: i32) -> (i32, i32) {
    %c0_i32 = arith.constant 0 : i32
    %c0_i32_0 = arith.constant 0 : i32
    return %arg0, %c0_i32 : i32, i32
  }
  func.func @transform_1(%arg0: i32) -> (i32, i32) {
    %c0_i32 = arith.constant 0 : i32
    %c0_i32_0 = arith.constant 0 : i32
    %c0_i32_1 = arith.constant 0 : i32
    return %c0_i32, %c0_i32_0 : i32, i32
  }
  func.func @transform_2(%arg0: i32) -> (i32, i32) {
    %c0_i32 = arith.constant 0 : i32
    %c0_i32_0 = arith.constant 0 : i32
    %c0_i32_1 = arith.constant 0 : i32
    return %c0_i32, %c0_i32_0 : i32, i32
  }
  func.func @transform_3(%arg0: i32) -> (i32, i32) {
    %c0_i32 = arith.constant 0 : i32
    %c0_i32_0 = arith.constant 0 : i32
    return %arg0, %c0_i32 : i32, i32
  }
}

</mosaic_0001>

<bundles_post_ra>
// kernel: _lambda_.1
= control target key start
LH: loop header
LB: loop body
LE: loop exit
PB: predicated region body
PF: predicated region fallthrough
CT: control target
= control target key end

     0   :  { %8 = vsyncpa [#allocation3], 0  ;;  %s843_s0 = inlined_call_operand.vmem [shape: f32[8,256], index: 0, kind: input, shape index: {}]   ;;  %s844_s1 = inlined_call_operand.hbm [shape: bf16[256,512], index: 1, kind: input, shape index: {}]   ;;  %s845_s2 = inlined_call_operand.vmem [shape: f32[1,512], index: 2, kind: input, shape index: {}]   ;;  %s846_s3 = inlined_call_operand.hbm [shape: f32[8,32], index: 3, kind: output, shape index: {}]  }
   0x1   :  { %9 = vsyncpa [#allocation4], 0  ;;  %s781_s12 = smov [#allocation2]   ;;  %s733_s16 = scalar_lea.hbm %s844_s1, 8192 }
   0x2   :  { %s17_s13 = sshll.u32 %s781_s12, 4  ;;  %p734_p0 = scmp.ne.s32.totalorder %s844_s1, %s733_s16  ;;  %s18_s13 = int_to_ptr.vmem [resolvable:$true] %s17_s13 }
   0x3   :  { %p737_p1 = scmp.lt.u32.totalorder %s733_s16, %s844_s1 }
   0x5   :  { %p739_p2 = pnand %p737_p1, %p734_p0 }
   0x7   :  { %742 = shalt.err (!%p739_p2)
}
   0x8   :  { %s743_s21 = scalar_lea.vmem %s18_s13, 8192  ;;  %p748_p4 = scmp.lt.s32.totalorder %s18_s13, %s18_s13 }
   0x9   :  { %p744_p3 = scmp.ne.s32.totalorder %s18_s13, %s743_s21  ;;  %p749_p5 = scmp.lt.s32.totalorder %s743_s21, %s743_s21 }
   0xb   :  { %p750_p6 = por %p749_p5, %p748_p4 }
   0xd   :  { %p751_p7 = pnand %p750_p6, %p744_p3 }
   0xf   :  { %754 = shalt.err (!%p751_p7)
}
  0x10   :  { %s782_s22 = smov 256   ;;  %s783_s23 = smov 16  }
  0x11   :  { %23 = dma.hbm_to_vmem [thread:$0]  %s844_s1, 8192, %s18_s13, [#allocation3], %s782_s22, %s782_s22, %s783_s23  }
  0x12   :  { %777 = dma.done.wait [#allocation3], 8192  }
  0x13   :  { %778 = vsyncadd [#allocation3], 4294959104  ;;  %v629_v0 = vld [vmem:[#allocation2 + $0x4] ss:$16 sps:$4 sm:$0xff]   ;;  %v631_v1 = vld [vmem:[#allocation2 + $0xc] ss:$16 sps:$4 sm:$0xff]  }
  0x14   :  { %439 = vmatprep.subr.bf16.mxu0 %v629_v0  ;;  %v633_v2 = vld [vmem:[#allocation2] ss:$16 sps:$4 sm:$0xff]   ;;  %v634_v3 = vld [vmem:[#allocation2 + $0x8] ss:$16 sps:$4 sm:$0xff]   ;;  %480 = vmatprep.subr.bf16.mxu1 %v631_v1  ;;  %v635_v4 = vld [vmem:[#allocation2 + $0x24] ss:$16 sps:$4 sm:$0xff]  }
  0x15   :  { %440 = vmatpush1.bf16.msra.mxu0 %v633_v2  ;;  %481 = vmatpush1.bf16.msra.mxu1 %v634_v3  ;;  %v637_v5 = vld [vmem:[#allocation2 + $0x2c] ss:$16 sps:$4 sm:$0xff]   ;;  %v639_v6 = vld [vmem:[#allocation2 + $0x20] ss:$16 sps:$4 sm:$0xff]   ;;  %v640_v7 = vld [vmem:[#allocation2 + $0x28] ss:$16 sps:$4 sm:$0xff]  }
  0x16   :  { %441 = vmatprep.subr.bf16.mxu0 %v635_v4  ;;  %482 = vmatprep.subr.bf16.mxu1 %v637_v5  ;;  %v641_v8 = vld [vmem:[#allocation2 + $0x44] ss:$16 sps:$4 sm:$0xff]   ;;  %v643_v9 = vld [vmem:[#allocation2 + $0x4c] ss:$16 sps:$4 sm:$0xff]   ;;  %v645_v10 = vld [vmem:[#allocation2 + $0x40] ss:$16 sps:$4 sm:$0xff]   ;;  %v99_v4 = vlaneseq }
  0x17   :  { %v646_v11 = vld [vmem:[#allocation2 + $0x48] ss:$16 sps:$4 sm:$0xff]   ;;  %v647_v12 = vld [vmem:[#allocation2 + $0x64] ss:$16 sps:$4 sm:$0xff]   ;;  %v649_v13 = vld [vmem:[#allocation2 + $0x6c] ss:$16 sps:$4 sm:$0xff]  }
  0x18   :  { %v651_v14 = vld [vmem:[#allocation2 + $0x60] ss:$16 sps:$4 sm:$0xff]   ;;  %v652_v15 = vld [vmem:[#allocation2 + $0x68] ss:$16 sps:$4 sm:$0xff]   ;;  %v653_v16 = vld [vmem:[#allocation2 + $0x84] ss:$16 sps:$4 sm:$0xff]  }
  0x19   :  { %442 = vmatpush1.bf16.msra.mxu0 %v639_v6  ;;  %483 = vmatpush1.bf16.msra.mxu1 %v640_v7  ;;  %v655_v17 = vld [vmem:[#allocation2 + $0x8c] ss:$16 sps:$4 sm:$0xff]   ;;  %v657_v18 = vld [vmem:[#allocation2 + $0x80] ss:$16 sps:$4 sm:$0xff]   ;;  %v658_v19 = vld [vmem:[#allocation2 + $0x88] ss:$16 sps:$4 sm:$0xff]  }
  0x1a   :  { %443 = vmatprep.subr.bf16.mxu0 %v641_v8  ;;  %484 = vmatprep.subr.bf16.mxu1 %v643_v9  ;;  %v659_v20 = vld [vmem:[#allocation2 + $0xa4] ss:$16 sps:$4 sm:$0xff]   ;;  %v661_v21 = vld [vmem:[#allocation2 + $0xac] ss:$16 sps:$4 sm:$0xff]   ;;  %v663_v22 = vld [vmem:[#allocation2 + $0xa0] ss:$16 sps:$4 sm:$0xff]  }
  0x1b   :  { %v664_v23 = vld [vmem:[#allocation2 + $0xa8] ss:$16 sps:$4 sm:$0xff]   ;;  %v665_v24 = vld [vmem:[#allocation2 + $0xc4] ss:$16 sps:$4 sm:$0xff]   ;;  %v667_v25 = vld [vmem:[#allocation2 + $0xcc] ss:$16 sps:$4 sm:$0xff]  }
  0x1c   :  { %v669_v26 = vld [vmem:[#allocation2 + $0xc0] ss:$16 sps:$4 sm:$0xff]   ;;  %v670_v27 = vld [vmem:[#allocation2 + $0xc8] ss:$16 sps:$4 sm:$0xff]   ;;  %v671_v28 = vld [vmem:[#allocation2 + $0xe4] ss:$16 sps:$4 sm:$0xff]  }
  0x1d   :  { %444 = vmatpush1.bf16.msra.mxu0 %v645_v10  ;;  %485 = vmatpush1.bf16.msra.mxu1 %v646_v11  ;;  %v673_v29 = vld [vmem:[#allocation2 + $0xec] ss:$16 sps:$4 sm:$0xff]   ;;  %v675_v30 = vld [vmem:[#allocation2 + $0xe0] ss:$16 sps:$4 sm:$0xff]   ;;  %v676_v31 = vld [vmem:[#allocation2 + $0xe8] ss:$16 sps:$4 sm:$0xff]  }
  0x1e   :  { %445 = vmatprep.subr.bf16.mxu0 %v647_v12  ;;  %486 = vmatprep.subr.bf16.mxu1 %v649_v13  ;;  %v677_v32 = vld [vmem:[#allocation2 + $0x104] ss:$16 sps:$4 sm:$0xff]   ;;  %v679_v33 = vld [vmem:[#allocation2 + $0x10c] ss:$16 sps:$4 sm:$0xff]   ;;  %v681_v34 = vld [vmem:[#allocation2 + $0x100] ss:$16 sps:$4 sm:$0xff]  }
  0x1f   :  { %v682_v35 = vld [vmem:[#allocation2 + $0x108] ss:$16 sps:$4 sm:$0xff]   ;;  %v683_v36 = vld [vmem:[#allocation2 + $0x124] ss:$16 sps:$4 sm:$0xff]   ;;  %v685_v37 = vld [vmem:[#allocation2 + $0x12c] ss:$16 sps:$4 sm:$0xff]  }
  0x20   :  { %v687_v38 = vld [vmem:[#allocation2 + $0x120] ss:$16 sps:$4 sm:$0xff]   ;;  %v688_v39 = vld [vmem:[#allocation2 + $0x128] ss:$16 sps:$4 sm:$0xff]   ;;  %v689_v40 = vld [vmem:[#allocation2 + $0x144] ss:$16 sps:$4 sm:$0xff]  }
  0x21   :  { %446 = vmatpush1.bf16.msra.mxu0 %v651_v14  ;;  %487 = vmatpush1.bf16.msra.mxu1 %v652_v15  ;;  %v691_v41 = vld [vmem:[#allocation2 + $0x14c] ss:$16 sps:$4 sm:$0xff]   ;;  %v693_v42 = vld [vmem:[#allocation2 + $0x140] ss:$16 sps:$4 sm:$0xff]   ;;  %v694_v43 = vld [vmem:[#allocation2 + $0x148] ss:$16 sps:$4 sm:$0xff]  }
  0x22   :  { %447 = vmatprep.subr.bf16.mxu0 %v653_v16  ;;  %488 = vmatprep.subr.bf16.mxu1 %v655_v17  ;;  %v695_v44 = vld [vmem:[#allocation2 + $0x164] ss:$16 sps:$4 sm:$0xff]   ;;  %v697_v45 = vld [vmem:[#allocation2 + $0x16c] ss:$16 sps:$4 sm:$0xff]   ;;  %v699_v48 = vld [vmem:[#allocation2 + $0x160] ss:$16 sps:$4 sm:$0xff]  }
  0x23   :  { %v820_v46 = vld [vmem:[%s843_s0 + $0x8] sm:$0xff]  ;;  %v701_v50 = vld [vmem:[#allocation2 + $0x184] ss:$16 sps:$4 sm:$0xff]   ;;  %v705_v52 = vld [vmem:[#allocation2 + $0x180] ss:$16 sps:$4 sm:$0xff]   ;;  %v100_v5 = vshrl.u32 %v99_v4, 7 }
  0x24   :  { %v32_v47 = vpack.c.bf16 %v820_v46, %v820_v46  ;;  %v700_v49 = vld [vmem:[#allocation2 + $0x168] ss:$16 sps:$4 sm:$0xff]   ;;  %v703_v51 = vld [vmem:[#allocation2 + $0x18c] ss:$16 sps:$4 sm:$0xff]   ;;  %v707_v54 = vld [vmem:[#allocation2 + $0x1a4] ss:$16 sps:$4 sm:$0xff]  }
  0x25   :  { %448 = vmatpush1.bf16.msra.mxu0 %v657_v18  ;;  %489 = vmatpush1.bf16.msra.mxu1 %v658_v19  ;;  %v706_v53 = vld [vmem:[#allocation2 + $0x188] ss:$16 sps:$4 sm:$0xff]   ;;  %v709_v55 = vld [vmem:[#allocation2 + $0x1ac] ss:$16 sps:$4 sm:$0xff]   ;;  %v711_v56 = vld [vmem:[#allocation2 + $0x1a0] ss:$16 sps:$4 sm:$0xff]  }
  0x26   :  { %449 = vmatprep.subr.bf16.mxu0 %v659_v20  ;;  %490 = vmatprep.subr.bf16.mxu1 %v661_v21  ;;  %v712_v57 = vld [vmem:[#allocation2 + $0x1a8] ss:$16 sps:$4 sm:$0xff]   ;;  %v713_v58 = vld [vmem:[#allocation2 + $0x1c4] ss:$16 sps:$4 sm:$0xff]   ;;  %v715_v59 = vld [vmem:[#allocation2 + $0x1cc] ss:$16 sps:$4 sm:$0xff]  }
  0x27   :  { %471 = vmatprep.mubr.bf16.mxu0 %v32_v47  ;;  %512 = vmatprep.mubr.bf16.mxu1 %v32_v47  ;;  %v717_v60 = vld [vmem:[#allocation2 + $0x1c0] ss:$16 sps:$4 sm:$0xff]   ;;  %v718_v61 = vld [vmem:[#allocation2 + $0x1c8] ss:$16 sps:$4 sm:$0xff]   ;;  %v719_v62 = vld [vmem:[#allocation2 + $0x1e4] ss:$16 sps:$4 sm:$0xff]  }
  0x28   :  { %v721_v63 = vld [vmem:[#allocation2 + $0x1ec] ss:$16 sps:$4 sm:$0xff]   ;;  %v723_v0 = vld [vmem:[#allocation2 + $0x1e0] ss:$16 sps:$4 sm:$0xff]   ;;  %v724_v1 = vld [vmem:[#allocation2 + $0x1e8] ss:$16 sps:$4 sm:$0xff]  }
  0x29   :  { %450 = vmatpush1.bf16.msra.mxu0 %v663_v22  ;;  %491 = vmatpush1.bf16.msra.mxu1 %v664_v23  ;;  %v29_v2 = vld [vmem:[%s843_s0] sm:$0xff]  ;;  %v109_v6 = vsub.s32 2, %v100_v5  ;;  %v105_v8 = vsub.s32 1, %v100_v5  ;;  %v113_v9 = vsub.s32 3, %v100_v5  ;;  %s784_s0 = smov [#allocation5]   ;;  %vm544_vm0 = vcmask 261120  }
  0x2a   :  { %451 = vmatprep.subr.bf16.mxu0 %v665_v24  ;;  %492 = vmatprep.subr.bf16.mxu1 %v667_v25  ;;  %v31_v3 = vpack.c.bf16 %v29_v2, %v29_v2  ;;  %v97_v7 = vld [vmem:[%s845_s2] sm:$0xf]  ;;  %s552_s2 = sshll.u32 %s784_s0, 4  ;;  %s553_s2 = int_to_ptr.vmem [resolvable:$true] %s552_s2 }
  0x2b   :  { %v110_v10 = vrot.slane %v97_v7, %v109_v6  ;;  %v106_v11 = vrot.slane %v97_v7, %v105_v8  ;;  %v114_v14 = vrot.slane %v97_v7, %v113_v9  ;;  %s755_s4 = scalar_lea.vmem %s553_s2, 128  ;;  %p760_p9 = scmp.lt.s32.totalorder %s553_s2, %s553_s2 }
  0x2c   :  { %p756_p8 = scmp.ne.s32.totalorder %s553_s2, %s755_s4  ;;  %p761_p10 = scmp.lt.s32.totalorder %s755_s4, %s755_s4 }
  0x2d   :  { %452 = vmatpush1.bf16.msra.mxu0 %v669_v26  ;;  %493 = vmatpush1.bf16.msra.mxu1 %v670_v27 }
  0x2e   :  { %453 = vmatprep.subr.bf16.mxu0 %v671_v28  ;;  %494 = vmatprep.subr.bf16.mxu1 %v673_v29  ;;  %p762_p11 = por %p761_p10, %p760_p9 }
  0x30   :  { %p763_p12 = pnand %p762_p11, %p756_p8 }
  0x31   :  { %454 = vmatpush1.bf16.msra.mxu0 %v675_v30  ;;  %495 = vmatpush1.bf16.msra.mxu1 %v676_v31 }
  0x32   :  { %455 = vmatprep.subr.bf16.mxu0 %v677_v32  ;;  %496 = vmatprep.subr.bf16.mxu1 %v679_v33  ;;  %v101_v32 = vsub.s32 0, %v100_v5 }
  0x34   :  { %v102_v33 = vrot.slane %v97_v7, %v101_v32 }
  0x35   :  { %456 = vmatpush1.bf16.msra.mxu0 %v681_v34  ;;  %497 = vmatpush1.bf16.msra.mxu1 %v682_v35 }
  0x36   :  { %457 = vmatprep.subr.bf16.mxu0 %v683_v36  ;;  %498 = vmatprep.subr.bf16.mxu1 %v685_v37 }
  0x39   :  { %458 = vmatpush1.bf16.msra.mxu0 %v687_v38  ;;  %499 = vmatpush1.bf16.msra.mxu1 %v688_v39 }
  0x3a   :  { %459 = vmatprep.subr.bf16.mxu0 %v689_v40  ;;  %500 = vmatprep.subr.bf16.mxu1 %v691_v41 }
  0x3d   :  { %460 = vmatpush1.bf16.msra.mxu0 %v693_v42  ;;  %501 = vmatpush1.bf16.msra.mxu1 %v694_v43 }
  0x3e   :  { %461 = vmatprep.subr.bf16.mxu0 %v695_v44  ;;  %502 = vmatprep.subr.bf16.mxu1 %v697_v45 }
  0x41   :  { %462 = vmatpush1.bf16.msra.mxu0 %v699_v48  ;;  %503 = vmatpush1.bf16.msra.mxu1 %v700_v49 }
  0x42   :  { %463 = vmatprep.subr.bf16.mxu0 %v701_v50  ;;  %504 = vmatprep.subr.bf16.mxu1 %v703_v51 }
  0x45   :  { %464 = vmatpush1.bf16.msra.mxu0 %v705_v52  ;;  %505 = vmatpush1.bf16.msra.mxu1 %v706_v53 }
  0x46   :  { %465 = vmatprep.subr.bf16.mxu0 %v707_v54  ;;  %506 = vmatprep.subr.bf16.mxu1 %v709_v55 }
  0x49   :  { %466 = vmatpush1.bf16.msra.mxu0 %v711_v56  ;;  %507 = vmatpush1.bf16.msra.mxu1 %v712_v57 }
  0x4a   :  { %467 = vmatprep.subr.bf16.mxu0 %v713_v58  ;;  %508 = vmatprep.subr.bf16.mxu1 %v715_v59 }
  0x4d   :  { %468 = vmatpush1.bf16.msra.mxu0 %v717_v60  ;;  %509 = vmatpush1.bf16.msra.mxu1 %v718_v61 }
  0x4e   :  { %469 = vmatprep.subr.bf16.mxu0 %v719_v62  ;;  %510 = vmatprep.subr.bf16.mxu1 %v721_v63 }
  0x51   :  { %470 = vmatpush1.bf16.msra.mxu0 %v723_v0  ;;  %511 = vmatpush1.bf16.msra.mxu1 %v724_v1 }
  0x54   :  { %472 = vmatmul.mubr.bf16.vlgmr.msra.gmra.mrb[0].mxu0 %v31_v3  ;;  %513 = vmatmul.mubr.bf16.vlgmr.msra.gmra.mrb[0].mxu1 %v31_v3 }
 0x127   :  { %v473_v12 = vpop.f32.mrb[0].mxu0  ;;  %v514_v13 = vpop.f32.mrb[0].mxu1 }
 0x128   :  { %v515_v15 = vadd.f32 %v514_v13, %v110_v10  ;;  %v475_v16 = vpop.f32.mrb[1].mxu0  ;;  %v516_v17 = vpop.f32.mrb[1].mxu1  ;;  %v474_v36 = vadd.f32 %v473_v12, %v102_v33 }
 0x129   :  { %v476_v18 = vadd.f32 %v475_v16, %v106_v11  ;;  %v477_v19 = vpop.f32.mrb[2].mxu0  ;;  %v518_v20 = vpop.f32.mrb[2].mxu1  ;;  %v517_v24 = vadd.f32 %v516_v17, %v114_v14 }
 0x12a   :  { %v478_v21 = vpop.f32.mrb[3].mxu0  ;;  %v519_v22 = vpop.f32.mrb[3].mxu1 }
 0x12b   :  { %v521_v23 = vmax.f32 %v476_v18, %v515_v15 }
 0x12d   :  { %v522_v25 = vmax.f32 %v521_v23, %v517_v24 }
 0x12f   :  { %v523_v26 = vsub.f32 %v476_v18, %v522_v25  ;;  %v526_v27 = vsub.f32 %v515_v15, %v522_v25  ;;  %v529_v28 = vsub.f32 %v517_v24, %v522_v25 }
 0x131   :  { %v524_v29 = vmul.f32 1.442695, %v523_v26  ;;  %v527_v30 = vmul.f32 1.442695, %v526_v27  ;;  %v530_v31 = vmul.f32 1.442695, %v529_v28 }
 0x133   :  { %725 = vpow2.f32 %v524_v29 }
 0x134   :  { %727 = vpow2.f32 %v527_v30 }
 0x135   :  { %729 = vpow2.f32 %v530_v31 }
 0x13d   :  { %v726_v34 = vpop.eup %725 }
 0x13e   :  { %v728_v35 = vpop.eup %727  ;;  %v538_v37 = vmul.f32 %v726_v34, %v29_v2 }
 0x13f   :  { %v730_v38 = vpop.eup %729  ;;  %v532_v39 = vadd.f32 %v728_v35, %v726_v34  ;;  %v539_v40 = vmul.f32 %v728_v35, %v820_v46 }
 0x140   :  { %v541_v41 = vmul.f32 %v730_v38, %v474_v36 }
 0x141   :  { %v533_v42 = vadd.f32 %v730_v38, %v532_v39  ;;  %v540_v43 = vadd.f32 %v539_v40, %v538_v37 }
 0x143   :  { %731 = vrcp.f32 %v533_v42  ;;  %v542_v44 = vadd.f32 %v541_v41, %v540_v43 }
 0x14d   :  { %v732_v45 = vpop.eup %731 }
 0x14e   :  { %v535_v47 = vmul.f32 %v732_v45, %v533_v42 }
 0x150   :  { %v536_v48 = vsub.f32 2.0, %v535_v47 }
 0x152   :  { %v537_v49 = vmul.f32 %v732_v45, %v536_v48 }
 0x154   :  { %v543_v50 = vmul.f32 %v542_v44, %v537_v49 }
 0x156   :  { %545 = vst.msk [vmem:[#allocation5] sm:$0xff] %vm544_vm0, %v543_v50 }
 0x157   :  { %766 = shalt.err (!%p763_p12)
}
 0x158   :  { %s767_s7 = scalar_lea.hbm %s846_s3, 128 }
 0x159   :  { %p768_p13 = scmp.ne.s32.totalorder %s846_s3, %s767_s7  ;;  %p771_p0 = scmp.lt.u32.totalorder %s767_s7, %s846_s3 }
 0x15b   :  { %p773_p1 = pnand %p771_p0, %p768_p13 }
 0x15d   :  { %776 = shalt.err (!%p773_p1)
}
 0x15e   :  { %555 = dma.vmem_to_hbm [thread:$0]  %s553_s2, 128, %s846_s3, [#allocation4]  }
 0x15f   :  { %779 = dma.done.wait [#allocation4], 128  }
 0x160   :  { %780 = vsyncadd [#allocation4], 4294967168 }
 0x161   :  { %559 = vsyncpa [#allocation3], 1 }
 0x162   :  { %560 = vsyncpa [#allocation4], 1 }

</bundles_post_ra>
